<compile_context>
chip_gen: v6e
topology: v6e:2x2x1
jax: 0.10.0
libtpu: 0.0.40
codegen_flags: <defaults>
</compile_context>

<pallas_src>
import jax
import jax.numpy as jnp
from jax.experimental import pallas as pl
from jax.experimental.pallas import tpu as pltpu


def _conv1x1_kernel(x_ref, w_ref, b_ref, o_ref):
    # x_ref: (C_in, TILE_HW)   pixel tile, lanes = spatial positions
    # w_ref: (C_out, C_in)     full 1x1-conv weight (resident across the grid)
    # b_ref: (C_out, 1)        bias, broadcast over lanes
    # o_ref: (C_out, TILE_HW)
    acc = jnp.dot(w_ref[...], x_ref[...], preferred_element_type=jnp.float32)
    o_ref[...] = (acc + b_ref[...]).astype(o_ref.dtype)


def _pick_tile_hw(hw, c_in, c_out, itemsize):
    """Largest lane tile (multiple of 128, <= 2048) whose double-buffered
    x + out footprint stays under a conservative 8 MiB VMEM budget."""
    vmem_budget = 8 * 1024 * 1024
    per_lane = 2 * (c_in + c_out) * itemsize          # double-buffered bytes per lane
    cap = (vmem_budget // per_lane) // 128 * 128
    cap = max(128, min(2048, cap))
    if hw <= cap:
        return hw                                      # full extent (always legal block)
    return cap


def conv1x1_pallas(x_nchw, weight, bias):
    """1x1 conv, stride 1, padding 0, consuming NCHW directly.

    x_nchw : (N, C_in, H, W)
    weight : (C_out, C_in)   (1x1 kernel squeezed)
    bias   : (C_out,)
    returns: (N, C_out, H, W)
    """
    n, c_in, h, w = x_nchw.shape
    c_out = weight.shape[0]
    hw = h * w

    # Free reshape (no transpose): spatial positions become the lane axis.
    x3d = x_nchw.reshape(n, c_in, hw)
    w2d = weight.astype(x_nchw.dtype)     # (C_out, C_in); f32 in, acc stays f32
    b2d = bias.reshape(c_out, 1).astype(jnp.float32)

    tile = _pick_tile_hw(hw, c_in, c_out, x_nchw.dtype.itemsize)
    grid = (n, pl.cdiv(hw, tile))

    cost = pl.CostEstimate(
        flops=2 * n * hw * c_in * c_out,
        transcendentals=0,
        bytes_accessed=(n * hw * (c_in + c_out) + c_in * c_out + c_out)
        * x_nchw.dtype.itemsize,
    )

    out3d = pl.pallas_call(
        _conv1x1_kernel,
        out_shape=jax.ShapeDtypeStruct((n, c_out, hw), x_nchw.dtype),
        grid_spec=pltpu.PrefetchScalarGridSpec(
            num_scalar_prefetch=0,
            grid=grid,
            in_specs=[
                # x: one batch element (squeezed), all channels, one HW tile.
                pl.BlockSpec((None, c_in, tile), lambda b, j: (b, 0, j)),
                # weight / bias: same block every step (stay resident in VMEM).
                pl.BlockSpec((c_out, c_in), lambda b, j: (0, 0)),
                pl.BlockSpec((c_out, 1), lambda b, j: (0, 0)),
            ],
            out_specs=pl.BlockSpec((None, c_out, tile), lambda b, j: (b, 0, j)),
        ),
        compiler_params=pltpu.CompilerParams(
            dimension_semantics=("parallel", "parallel")),
        cost_estimate=cost,
    )(x3d, w2d, b2d)

    return out3d.reshape(n, c_out, h, w)


class FixedChannelReducer:
    """JAX/Pallas equivalent of the PyTorch FixedChannelReducer module."""

    def __init__(self, in_channels: int = 384, out_channels: int = 192, key=None):
        self.in_channels = in_channels
        self.out_channels = out_channels
        # Weight is deterministically filled with 1/in_channels (as in the module).
        self.weight = jnp.full((out_channels, in_channels),
                               1.0 / in_channels, dtype=jnp.float32)
        # nn.Conv2d's bias keeps its default uniform(-1/sqrt(fan_in), +bound) init;
        # reproduced deterministically with a fixed JAX key (same semantics, not
        # bit-identical to a torch instantiation).
        if key is None:
            key = jax.random.PRNGKey(42)
        bound = 1.0 / (in_channels ** 0.5)
        self.bias = jax.random.uniform(key, (out_channels,), dtype=jnp.float32,
                                       minval=-bound, maxval=bound)

    def __call__(self, x_nchw):
        return conv1x1_pallas(x_nchw, self.weight, self.bias)


if __name__ == "__main__":
    key = jax.random.PRNGKey(0)
    k_x, k_b = jax.random.split(key)

    # Module defaults: 384 -> 192 channels; small batch and spatial extent.
    # HW = 256 lanes per batch element, grid = (2, 1).
    N, C_IN, C_OUT, H, W = 2, 384, 192, 16, 16
    x = jax.random.normal(k_x, (N, C_IN, H, W), dtype=jnp.float32)

    model = FixedChannelReducer(C_IN, C_OUT, key=k_b)
    out = jax.block_until_ready(model(x))

    # Reference check (plain JAX): same 1x1 conv.
    ref = jnp.einsum("nchw,oc->nohw", x, model.weight) + model.bias[None, :, None, None]
    assert out.shape == (N, C_OUT, H, W)
    assert jnp.allclose(out, ref, atol=1e-5, rtol=1e-5), float(
        jnp.max(jnp.abs(out - ref)))

    print("KERNEL_OK")
</pallas_src>

<mosaic_0001>
module attributes {stable_mosaic.version = 11 : i64} {
  func.func @_conv1x1_kernel(%arg0: i32, %arg1: i32, %arg2: memref<1x384x256xf32, #tpu.memory_space<vmem>>, %arg3: memref<192x384xf32, #tpu.memory_space<vmem>>, %arg4: memref<192x1xf32, #tpu.memory_space<vmem>>, %arg5: memref<1x192x256xf32, #tpu.memory_space<vmem>>) attributes {dimension_semantics = [#tpu.dimension_semantics<parallel>, #tpu.dimension_semantics<parallel>], iteration_bounds = array<i64: 2, 1>, scalar_prefetch = 0 : i64, scratch_operands = 0 : i64, tpu.core_type = #tpu.core_type<tc>, window_params = [{transform_indices = @transform_0, window_bounds = array<i64: 1, 384, 256>}, {pipeline_mode = #tpu.pipeline_mode<synchronous>, transform_indices = @transform_1, window_bounds = array<i64: 192, 384>}, {pipeline_mode = #tpu.pipeline_mode<synchronous>, transform_indices = @transform_2, window_bounds = array<i64: 192, 1>}, {transform_indices = @transform_3, window_bounds = array<i64: 1, 192, 256>}]} {
    %c0 = arith.constant 0 : index
    %c0_0 = arith.constant 0 : index
    %0 = vector.load %arg3[%c0, %c0_0] : memref<192x384xf32, #tpu.memory_space<vmem>>, vector<192x384xf32>
    %c0_1 = arith.constant 0 : index
    %c0_2 = arith.constant 0 : index
    %c0_3 = arith.constant 0 : index
    %1 = vector.load %arg2[%c0_1, %c0_2, %c0_3] : memref<1x384x256xf32, #tpu.memory_space<vmem>>, vector<1x384x256xf32>
    %2 = vector.shape_cast %1 : vector<1x384x256xf32> to vector<384x256xf32>
    %cst = arith.constant dense<0.000000e+00> : vector<192x256xf32>
    %3 = tpu.matmul %0, %2, %cst {dimension_numbers = #tpu.dot_dimension_numbers<[1], [0], [0], [1], [0, 0, 1, 1], [], []>} : vector<192x384xf32>, vector<384x256xf32>, vector<192x256xf32> -> vector<192x256xf32>
    %c0_4 = arith.constant 0 : index
    %c0_5 = arith.constant 0 : index
    %4 = vector.load %arg4[%c0_4, %c0_5] : memref<192x1xf32, #tpu.memory_space<vmem>>, vector<192x1xf32>
    %5 = vector.broadcast %4 : vector<192x1xf32> to vector<192x256xf32>
    %6 = arith.addf %3, %5 : vector<192x256xf32>
    %c0_6 = arith.constant 0 : index
    %c0_7 = arith.constant 0 : index
    %c0_8 = arith.constant 0 : index
    %7 = vector.load %arg5[%c0_6, %c0_7, %c0_8] : memref<1x192x256xf32, #tpu.memory_space<vmem>>, vector<1x192x256xf32>
    %8 = vector.shape_cast %7 : vector<1x192x256xf32> to vector<192x256xf32>
    %9 = vector.shape_cast %6 : vector<192x256xf32> to vector<1x192x256xf32>
    tpu.vector_store %arg5[%c0_6, %c0_7, %c0_8], %9 {strides = array<i32>} : memref<1x192x256xf32, #tpu.memory_space<vmem>>, vector<1x192x256xf32>,
    return
  }
  func.func @transform_0(%arg0: i32, %arg1: i32) -> (i32, i32, i32) {
    %c0_i32 = arith.constant 0 : i32
    %c0_i32_0 = arith.constant 0 : i32
    return %arg0, %c0_i32, %arg1 : i32, i32, i32
  }
  func.func @transform_1(%arg0: i32, %arg1: i32) -> (i32, i32) {
    %c0_i32 = arith.constant 0 : i32
    %c0_i32_0 = arith.constant 0 : i32
    %c0_i32_1 = arith.constant 0 : i32
    return %c0_i32, %c0_i32_0 : i32, i32
  }
  func.func @transform_2(%arg0: i32, %arg1: i32) -> (i32, i32) {
    %c0_i32 = arith.constant 0 : i32
    %c0_i32_0 = arith.constant 0 : i32
    %c0_i32_1 = arith.constant 0 : i32
    return %c0_i32, %c0_i32_0 : i32, i32
  }
  func.func @transform_3(%arg0: i32, %arg1: i32) -> (i32, i32, i32) {
    %c0_i32 = arith.constant 0 : i32
    %c0_i32_0 = arith.constant 0 : i32
    return %arg0, %c0_i32, %arg1 : i32, i32, i32
  }
}

</mosaic_0001>

<bundles_post_ra>
// kernel: tpu_custom_call.1
= control target key start
LH: loop header
LB: loop body
LE: loop exit
PB: predicated region body
PF: predicated region fallthrough
CT: control target
= control target key end

     0   :  { %8 = vsyncpa [#allocation3], 0  ;;  %s1845_s0 = inlined_call_operand.hbm [shape: f32[2,384,256], index: 0, kind: input, shape index: {}]   ;;  %s1846_s1 = inlined_call_operand.hbm [shape: f32[192,384], index: 1, kind: input, shape index: {}]   ;;  %s1847_s2 = inlined_call_operand.vmem [shape: f32[192,1], index: 2, kind: input, shape index: {}]   ;;  %s1848_s3 = inlined_call_operand.hbm [shape: f32[2,192,256], index: 3, kind: output, shape index: {}]  }
   0x1   :  { %10 = vsyncpa [#allocation3 + $0x1], 0 }
   0x2   :  { %11 = vsyncpa [#allocation6], 0 }
   0x3   :  { %12 = vsyncpa [#allocation4], 0 }
   0x4   :  { %14 = vsyncpa [#allocation4 + $0x1], 0  ;;  %s1385_s12 = smov 0   ;;  %s1387_s13 = smov 0  }
   0x5   :  { %s1389_s14 = smov 0   ;;  %s1391_s15 = smov 0  }
   0x6   :  { %s1393_s16 = smov 0   ;;  %s1395_s17 = smov 0  }
   0x7 LB: > { %s1115_s18 = sadd.s32 4294967295, %s1352_s17   ;;  %s1116_s19 = sadd.s32 4294967294, %s1352_s17   ;;  %s1352_s17 = sphi %s1395_s17, %s20_s17   ;;  %s1348_s16 = sphi %s1393_s16, %s1864_s16   ;;  %s1344_s15 = sphi %s1391_s15, %s1863_s15   ;;  %s1340_s14 = sphi %s1389_s14, %s1862_s14   ;;  %s1336_s13 = sphi %s1387_s13, %s1861_s13   ;;  %s1332_s12 = sphi %s1385_s12, %s1860_s12  }
   0x8   : > { %p54_p0 = scmp.ne.s32.totalorder %s1336_s13, %s1332_s12  ;;  %p1419_p1 = scmp.eq.s32.totalorder %s1115_s18, 0 }
   0x9   : > { %p1423_p2 = scmp.eq.s32.totalorder %s1115_s18, 1  ;;  %p128_p3 = scmp.eq.s32.totalorder %s1116_s19, 1 }
   0xa   : > { %p1429_p4 = por %p1419_p1, %p54_p0  ;;  %p1117_p5 = scmp.ge.s32.totalorder %s1352_s17, 1 }
   0xb   : > { %p1434_p6 = por %p128_p3, %p54_p0  ;;  %p135_p7 = scmp.lt.s32.totalorder %s1352_s17, 3 }
   0xc   : > { %s1852_s22 = scalar_select %p1429_p4, 1, 0 }
   0xd   : > { %s1853_s23 = scalar_select %p1434_p6, 1, 0 }
   0xe   : > { %p1439_p8 = pnand %p1117_p5, %p135_p7  ;;  %s1354_s25 = smov [#allocation5]  }
   0xf   : > { %s147_s26 = sshll.u32 %s1354_s25, 4  ;;  %p1119_p10 = scmp.ge.s32.totalorder %s1352_s17, 2  ;;  %s148_s26 = int_to_ptr.vmem [resolvable:$true] %s147_s26 }
  0x10   : > { %p1139_p9 = pneg %p1439_p8  ;;  %s32_s28 = sadd.s32 1, %s1348_s16 }
  0x11   : > { %s1225_s29 = scalar_lea.vmem %s148_s26, 9216  ;;  %p1233_p5 = scmp.lt.s32.totalorder %s148_s26, %s148_s26 }
  0x12   : > { %p1448_p11 = pnand %p1139_p9, %p1419_p1  ;;  %p1226_p13 = scmp.ne.s32.totalorder %s148_s26, %s1225_s29 }
  0x13   : > { %p1234_p7 = scmp.lt.s32.totalorder %s1225_s29, %s1225_s29 }
  0x14   : > { %p1216_p12 = pneg %p1448_p11 }
  0x15   : > { %p1235_p6 = por %p1234_p7, %p1233_p5 }
  0x16   : > { %p1228_p0 = pnand %p1226_p13, %p1216_p12 }
  0x18   : > { %p1229_p3 = pneg %p1228_p0 }
  0x1a   : > { %p1236_p4 = pnand %p1235_p6, %p1229_p3 }
  0x1c   : > { %1239 = shalt.err (!%p1236_p4)
}
  0x1d   : > { %s1355_s30 = smov 384   ;;  %s1356_s4 = smov 24  }
  0x1e   : > { %1142 = dma.hbm_to_vmem [thread:$0]  (!%p1448_p11), %s1846_s1, 9216, %s148_s26, [#allocation6], %s1355_s30, %s1355_s30, %s1356_s4  }
  0x1f   : > { %p34_p6 = scmp.ge.s32.totalorder %s32_s28, 2  ;;  %s41_s7 = sadd.s32 1, %s1340_s14 }
  0x20   : > { %p48_p4 = scmp.ne.s32.totalorder %s1340_s14, %s1336_s13  ;;  %p49_p9 = scmp.eq.s32.totalorder %s1352_s17, 0 }
  0x21   : > { %s1866_s28 = smov (%p34_p6, %s32_s28), 0  ;;  %p1152_p0 = scmp.lt.s32.totalorder %s1352_s17, 2 }
  0x22   : > { %p50_p12 = por %p49_p9, %p48_p4  ;;  %p1468_p13 = por %p1423_p2, %p48_p4 }
  0x23   : > { %s36_s9 = ssub.s32 %s1348_s16, %s1866_s28  ;;  %s164_s10 = sand.u32 1, %s1340_s14  }
  0x24   : > { %p39_p3 = scmp.eq.s32.totalorder %s36_s9, 0  ;;  %s1126_s11 = smul.u32 768, %s164_s10 }
  0x25   : > { %s1127_s19 = smul.u32 12288, %s1348_s16  ;;  %p1480_p11 = pnand %p1152_p0, %p50_p12 }
  0x26   : > { %s1477_s18 = scalar_select %p39_p3, %s1340_s14, %s41_s7  }
  0x27   : > { %s168_s25 = scalar_lea.vmem [#allocation2], %s1126_s11  ;;  %s176_s30 = scalar_lea.hbm %s1845_s0, %s1127_s19 }
  0x28   : > { %s177_s26 = sshll.u32 %s168_s25, 4  ;;  %s165_s4 = scalar_lea.sflag [#allocation3], %s164_s10  ;;  %s178_s26 = int_to_ptr.vmem [resolvable:$true] %s177_s26 }
  0x29   : > { %p1242_p2 = pneg %p1480_p11  ;;  %s1253_s5 = scalar_lea.vmem %s178_s26, 12288 }
  0x2a   : > { %p1254_p5 = scmp.ne.s32.totalorder %s178_s26, %s1253_s5  ;;  %s1357_s6 = smov [#allocation2]  }
  0x2b   : > { %s1258_s7 = sshll.u32 %s1357_s6, 4  ;;  %s1259_s7 = int_to_ptr.vmem [resolvable:$false] %s1258_s7 }
  0x2c   : > { %p1256_p7 = pnand %p1254_p5, %p1242_p2  ;;  %s1260_s9 = scalar_lea.vmem %s1259_s7, 24576 }
  0x2d   : > { %p1261_p4 = scmp.lt.s32.totalorder %s178_s26, %s1259_s7  ;;  %p1262_p9 = scmp.lt.s32.totalorder %s1260_s9, %s1253_s5 }
  0x2e   : > { %p1257_p6 = pneg %p1256_p7 }
  0x2f   : > { %p1263_p12 = por %p1262_p9, %p1261_p4 }
  0x31   : > { %p1264_p0 = pnand %p1263_p12, %p1257_p6 }
  0x33   : > { %1267 = shalt.err (!%p1264_p0)
}
  0x34   : > { %s1358_s11 = smov 256   ;;  %s1359_s19 = smov 16  }
  0x35   : > { %1146 = dma.hbm_to_vmem [thread:$0]  (!%p1480_p11), %s176_s30, 12288, %s178_s26, %s165_s4, %s1358_s11, %s1358_s11, %s1359_s19  }
  0x36   : > { %189 = sbr.rel (%p1439_p8) target bundleno = 432 (0x1b0), region = 32  ;;  %s1494_s10 = sand.u32 (!%p1439_p8), 1, %s1336_s13  }
  0x37   : > { %s1128_s25 = smul.u32 (!%p1439_p8), 768, %s1494_s10  ;;  %s192_s29 = scalar_lea.sflag (!%p1439_p8), [#allocation3], %s1494_s10 }
  0x38   : > { %p1858_p3 = scmp.ne.s32.totalorder (!%p1439_p8), %s1852_s22, 0 }
  0x39   : > { %s1498_s21 = scalar_lea.vmem (!%p1439_p8), [#allocation2], %s1128_s25 }
  0x3b   : > { %1319 = dma.done.wait (%p1858_p3), %s192_s29, 12288  }
  0x3c   : > { %1321 = vsyncadd (%p1858_p3), %s192_s29, 4294955008 }
  0x3d   : > { %1323 = dma.done.wait (%p1419_p1), [#allocation6], 9216  }
  0x3e   : > { %1325 = vsyncadd (%p1419_p1), [#allocation6], 4294958080  ;;  %v1360_v0 = vmov 0.0   ;;  %v327_v1 = vld [vmem:[%s1498_s21 + $0xf8] sm:$0xff]  ;;  %v326_v2 = vld [vmem:[%s1498_s21 + $0xf0] sm:$0xff]  ;;  %v1361_v7 = vmov 0  }
  0x3f   : > { %809 = vmatprep.mubr.f32.mxu1 %v1360_v0  ;;  %v325_v3 = vld [vmem:[%s1498_s21 + $0xe8] sm:$0xff]  ;;  %536 = vmatprep.subr.mxu0 %v327_v1  ;;  %v324_v4 = vld [vmem:[%s1498_s21 + $0xe0] sm:$0xff]  ;;  %v323_v5 = vld [vmem:[%s1498_s21 + $0xd8] sm:$0xff]  ;;  %s1129_s22 = smul.u32 384, %s1494_s10  ;;  %s1362_s6 = smov [#allocation7]  }
  0x40   : > { %537 = vmatpush1.msra.mxu0 %v326_v2  ;;  %v322_v6 = vld [vmem:[%s1498_s21 + $0xd0] sm:$0xff]  ;;  %1212 = vset.pattern.permute.xlu0 %v1361_v7  ;;  %v321_v8 = vld [vmem:[%s1498_s21 + $0xc8] sm:$0xff]  ;;  %v320_v9 = vld [vmem:[%s1498_s21 + $0xc0] sm:$0xff]  ;;  %s1272_s7 = sshll.u32 %s1362_s6, 4  ;;  %s1273_s7 = int_to_ptr.vmem [resolvable:$false] %s1272_s7 }
  0x41   : > { %538 = vmatprep.subr.mxu0 %v325_v3  ;;  %1213 = vset.pattern.permute.xlu1 %v1361_v7  ;;  %v319_v10 = vld [vmem:[%s1498_s21 + $0xb8] sm:$0xff]  ;;  %v318_v11 = vld [vmem:[%s1498_s21 + $0xb0] sm:$0xff]  ;;  %v317_v12 = vld [vmem:[%s1498_s21 + $0xa8] sm:$0xff]  ;;  %s1703_s24 = scalar_lea.vmem [#allocation7], %s1129_s22  ;;  %s1274_s9 = scalar_lea.vmem %s1273_s7, 12288 }
  0x42   : > { %539 = vmatpush1.msra.mxu0 %v324_v4  ;;  %v316_v13 = vld [vmem:[%s1498_s21 + $0xa0] sm:$0xff]  ;;  %v315_v14 = vld [vmem:[%s1498_s21 + $0x98] sm:$0xff]  ;;  %v314_v15 = vld [vmem:[%s1498_s21 + $0x90] sm:$0xff]  ;;  %s1018_s26 = sshll.u32 %s1703_s24, 4  ;;  %s1795_s26 = int_to_ptr.vmem [resolvable:$true] %s1018_s26 }
  0x43   : > { %540 = vmatprep.subr.mxu0 %v323_v5  ;;  %v391_v16 = vld [vmem:[%s1498_s21 + $0x2f8] sm:$0xff]  ;;  %v390_v17 = vld [vmem:[%s1498_s21 + $0x2f0] sm:$0xff]  ;;  %v313_v18 = vld [vmem:[%s1498_s21 + $0x88] sm:$0xff]  ;;  %s1268_s5 = scalar_lea.vmem %s1795_s26, 6144  ;;  %p1275_p2 = scmp.lt.s32.totalorder %s1795_s26, %s1273_s7 }
  0x44   : > { %541 = vmatpush1.msra.mxu0 %v322_v6  ;;  %745 = vmatprep.subr.mxu1 %v391_v16  ;;  %v389_v19 = vld [vmem:[%s1498_s21 + $0x2e8] sm:$0xff]  ;;  %v312_v20 = vld [vmem:[%s1498_s21 + $0x80] sm:$0xff]  ;;  %v387_v22 = vld [vmem:[%s1498_s21 + $0x2d8] sm:$0xff]  ;;  %p1269_p1 = scmp.ne.s32.totalorder %s1795_s26, %s1268_s5  ;;  %p1276_p5 = scmp.lt.s32.totalorder %s1274_s9, %s1268_s5 }
  0x45   : > { %542 = vmatprep.subr.mxu0 %v321_v8  ;;  %746 = vmatpush1.msra.mxu1 %v390_v17  ;;  %v388_v21 = vld [vmem:[%s1498_s21 + $0x2e0] sm:$0xff]  ;;  %v311_v23 = vld [vmem:[%s1498_s21 + $0x78] sm:$0xff]  ;;  %v386_v24 = vld [vmem:[%s1498_s21 + $0x2d0] sm:$0xff] }
  0x46   : > { %543 = vmatpush1.msra.mxu0 %v320_v9  ;;  %747 = vmatprep.subr.mxu1 %v389_v19  ;;  %v310_v25 = vld [vmem:[%s1498_s21 + $0x70] sm:$0xff]  ;;  %v385_v26 = vld [vmem:[%s1498_s21 + $0x2c8] sm:$0xff]  ;;  %v384_v28 = vld [vmem:[%s1498_s21 + $0x2c0] sm:$0xff]  ;;  %p1270_p8 = pnand %p1269_p1, %p1468_p13  ;;  %p1277_p7 = por %p1276_p5, %p1275_p2 }
  0x47   : > { %544 = vmatprep.subr.mxu0 %v319_v10  ;;  %748 = vmatpush1.msra.mxu1 %v388_v21  ;;  %v309_v27 = vld [vmem:[%s1498_s21 + $0x68] sm:$0xff]  ;;  %v308_v29 = vld [vmem:[%s1498_s21 + $0x60] sm:$0xff]  ;;  %v383_v30 = vld [vmem:[%s1498_s21 + $0x2b8] sm:$0xff] }
  0x48   : > { %545 = vmatpush1.msra.mxu0 %v318_v11  ;;  %749 = vmatprep.subr.mxu1 %v387_v22  ;;  %v307_v31 = vld [vmem:[%s1498_s21 + $0x58] sm:$0xff]  ;;  %v382_v32 = vld [vmem:[%s1498_s21 + $0x2b0] sm:$0xff]  ;;  %v381_v34 = vld [vmem:[%s1498_s21 + $0x2a8] sm:$0xff]  ;;  %p1271_p11 = pneg %p1270_p8 }
  0x49   : > { %546 = vmatprep.subr.mxu0 %v317_v12  ;;  %750 = vmatpush1.msra.mxu1 %v386_v24  ;;  %v306_v33 = vld [vmem:[%s1498_s21 + $0x50] sm:$0xff]  ;;  %v305_v35 = vld [vmem:[%s1498_s21 + $0x48] sm:$0xff]  ;;  %v380_v36 = vld [vmem:[%s1498_s21 + $0x2a0] sm:$0xff] }
  0x4a   : > { %547 = vmatpush1.msra.mxu0 %v316_v13  ;;  %751 = vmatprep.subr.mxu1 %v385_v26  ;;  %v304_v37 = vld [vmem:[%s1498_s21 + $0x40] sm:$0xff]  ;;  %v379_v38 = vld [vmem:[%s1498_s21 + $0x298] sm:$0xff]  ;;  %v378_v40 = vld [vmem:[%s1498_s21 + $0x290] sm:$0xff]  ;;  %p1278_p6 = pnand %p1277_p7, %p1271_p11 }
  0x4b   : > { %548 = vmatprep.subr.mxu0 %v315_v14  ;;  %752 = vmatpush1.msra.mxu1 %v384_v28  ;;  %v303_v39 = vld [vmem:[%s1498_s21 + $0x38] sm:$0xff]  ;;  %v302_v41 = vld [vmem:[%s1498_s21 + $0x30] sm:$0xff]  ;;  %v377_v42 = vld [vmem:[%s1498_s21 + $0x288] sm:$0xff] }
  0x4c   : > { %549 = vmatpush1.msra.mxu0 %v314_v15  ;;  %753 = vmatprep.subr.mxu1 %v383_v30  ;;  %v301_v43 = vld [vmem:[%s1498_s21 + $0x28] sm:$0xff]  ;;  %v376_v44 = vld [vmem:[%s1498_s21 + $0x280] sm:$0xff]  ;;  %v375_v46 = vld [vmem:[%s1498_s21 + $0x278] sm:$0xff] }
  0x4d   : > { %550 = vmatprep.subr.mxu0 %v313_v18  ;;  %754 = vmatpush1.msra.mxu1 %v382_v32  ;;  %v300_v45 = vld [vmem:[%s1498_s21 + $0x20] sm:$0xff]  ;;  %v299_v47 = vld [vmem:[%s1498_s21 + $0x18] sm:$0xff]  ;;  %v374_v48 = vld [vmem:[%s1498_s21 + $0x270] sm:$0xff] }
  0x4e   : > { %551 = vmatpush1.msra.mxu0 %v312_v20  ;;  %755 = vmatprep.subr.mxu1 %v381_v34  ;;  %v298_v49 = vld [vmem:[%s1498_s21 + $0x10] sm:$0xff]  ;;  %v373_v50 = vld [vmem:[%s1498_s21 + $0x268] sm:$0xff]  ;;  %v372_v52 = vld [vmem:[%s1498_s21 + $0x260] sm:$0xff] }
  0x4f   : > { %552 = vmatprep.subr.mxu0 %v311_v23  ;;  %756 = vmatpush1.msra.mxu1 %v380_v36  ;;  %v297_v51 = vld [vmem:[%s1498_s21 + $0x8] sm:$0xff]  ;;  %v296_v53 = vld [vmem:[%s1498_s21] sm:$0xff]  ;;  %v371_v54 = vld [vmem:[%s1498_s21 + $0x258] sm:$0xff] }
  0x50   : > { %553 = vmatpush1.msra.mxu0 %v310_v25  ;;  %757 = vmatprep.subr.mxu1 %v379_v38  ;;  %v359_v55 = vld [vmem:[%s1498_s21 + $0x1f8] sm:$0xff]  ;;  %v370_v56 = vld [vmem:[%s1498_s21 + $0x250] sm:$0xff]  ;;  %v369_v58 = vld [vmem:[%s1498_s21 + $0x248] sm:$0xff] }
  0x51   : > { %554 = vmatprep.subr.mxu0 %v309_v27  ;;  %758 = vmatpush1.msra.mxu1 %v378_v40  ;;  %v358_v57 = vld [vmem:[%s1498_s21 + $0x1f0] sm:$0xff]  ;;  %v357_v59 = vld [vmem:[%s1498_s21 + $0x1e8] sm:$0xff]  ;;  %v368_v60 = vld [vmem:[%s1498_s21 + $0x240] sm:$0xff] }
  0x52   : > { %555 = vmatpush1.msra.mxu0 %v308_v29  ;;  %759 = vmatprep.subr.mxu1 %v377_v42  ;;  %v356_v61 = vld [vmem:[%s1498_s21 + $0x1e0] sm:$0xff]  ;;  %v367_v62 = vld [vmem:[%s1498_s21 + $0x238] sm:$0xff]  ;;  %v366_v1 = vld [vmem:[%s1498_s21 + $0x230] sm:$0xff] }
  0x53   : > { %556 = vmatprep.subr.mxu0 %v307_v31  ;;  %760 = vmatpush1.msra.mxu1 %v376_v44  ;;  %v355_v63 = vld [vmem:[%s1498_s21 + $0x1d8] sm:$0xff]  ;;  %v354_v2 = vld [vmem:[%s1498_s21 + $0x1d0] sm:$0xff]  ;;  %v365_v3 = vld [vmem:[%s1498_s21 + $0x228] sm:$0xff] }
  0x54   : > { %557 = vmatpush1.msra.mxu0 %v306_v33  ;;  %761 = vmatprep.subr.mxu1 %v375_v46  ;;  %v353_v4 = vld [vmem:[%s1498_s21 + $0x1c8] sm:$0xff]  ;;  %v364_v5 = vld [vmem:[%s1498_s21 + $0x220] sm:$0xff]  ;;  %v363_v7 = vld [vmem:[%s1498_s21 + $0x218] sm:$0xff] }
  0x55   : > { %558 = vmatprep.subr.mxu0 %v305_v35  ;;  %762 = vmatpush1.msra.mxu1 %v374_v48  ;;  %v352_v6 = vld [vmem:[%s1498_s21 + $0x1c0] sm:$0xff]  ;;  %v351_v8 = vld [vmem:[%s1498_s21 + $0x1b8] sm:$0xff]  ;;  %v362_v9 = vld [vmem:[%s1498_s21 + $0x210] sm:$0xff] }
  0x56   : > { %559 = vmatpush1.msra.mxu0 %v304_v37  ;;  %763 = vmatprep.subr.mxu1 %v373_v50  ;;  %v350_v10 = vld [vmem:[%s1498_s21 + $0x1b0] sm:$0xff]  ;;  %v361_v11 = vld [vmem:[%s1498_s21 + $0x208] sm:$0xff]  ;;  %v348_v14 = vld [vmem:[%s1498_s21 + $0x1a0] sm:$0xff] }
  0x57   : > { %560 = vmatprep.subr.mxu0 %v303_v39  ;;  %764 = vmatpush1.msra.mxu1 %v372_v52  ;;  %v349_v12 = vld [vmem:[%s1498_s21 + $0x1a8] sm:$0xff]  ;;  %v360_v15 = vld [vmem:[%s1498_s21 + $0x200] sm:$0xff]  ;;  %v347_v16 = vld [vmem:[%s1498_s21 + $0x198] sm:$0xff] }
  0x58   : > { %561 = vmatpush1.msra.mxu0 %v302_v41  ;;  %765 = vmatprep.subr.mxu1 %v371_v54  ;;  %v225_v13 = vld [vmem:[#allocation5 + $0x8] sm:$0xff]  ;;  %v226_v17 = vld [vmem:[#allocation5 + $0x10] sm:$0xff]  ;;  %v344_v20 = vld [vmem:[%s1498_s21 + $0x180] sm:$0xff] }
  0x59   : > { %562 = vmatprep.subr.mxu0 %v301_v43  ;;  %766 = vmatpush1.msra.mxu1 %v370_v56  ;;  %v346_v18 = vld [vmem:[%s1498_s21 + $0x190] sm:$0xff]  ;;  %v345_v19 = vld [vmem:[%s1498_s21 + $0x188] sm:$0xff]  ;;  %v343_v21 = vld [vmem:[%s1498_s21 + $0x178] sm:$0xff] }
  0x5a   : > { %563 = vmatpush1.msra.mxu0 %v300_v45  ;;  %767 = vmatprep.subr.mxu1 %v369_v58  ;;  %v229_v22 = vld [vmem:[#allocation5 + $0x28] sm:$0xff]  ;;  %v342_v23 = vld [vmem:[%s1498_s21 + $0x170] sm:$0xff]  ;;  %v340_v25 = vld [vmem:[%s1498_s21 + $0x160] sm:$0xff] }
  0x5b   : > { %564 = vmatprep.subr.mxu0 %v299_v47  ;;  %768 = vmatpush1.msra.mxu1 %v368_v60  ;;  %v341_v24 = vld [vmem:[%s1498_s21 + $0x168] sm:$0xff]  ;;  %v339_v26 = vld [vmem:[%s1498_s21 + $0x158] sm:$0xff]  ;;  %v232_v27 = vld [vmem:[#allocation5 + $0x40] sm:$0xff] }
  0x5c   : > { %565 = vmatpush1.msra.mxu0 %v298_v49  ;;  %769 = vmatprep.subr.mxu1 %v367_v62  ;;  %v392_v28 = vld [vmem:[%s1847_s2] sm:$0xff]  ;;  %v338_v29 = vld [vmem:[%s1498_s21 + $0x150] sm:$0xff]  ;;  %v337_v31 = vld [vmem:[%s1498_s21 + $0x148] sm:$0xff] }
  0x5d   : > { %566 = vmatprep.subr.mxu0 %v297_v51  ;;  %770 = vmatpush1.msra.mxu1 %v366_v1  ;;  %v394_v30 = vld [vmem:[%s1847_s2 + $0x10] sm:$0xff]  ;;  %v393_v32 = vld [vmem:[%s1847_s2 + $0x8] sm:$0xff]  ;;  %v336_v33 = vld [vmem:[%s1498_s21 + $0x140] sm:$0xff] }
  0x5e   : > { %567 = vmatpush1.msra.mxu0 %v296_v53  ;;  %771 = vmatprep.subr.mxu1 %v365_v3  ;;  %v395_v34 = vld [vmem:[%s1847_s2 + $0x18] sm:$0xff]  ;;  %v334_v37 = vld [vmem:[%s1498_s21 + $0x130] sm:$0xff]  ;;  %v333_v38 = vld [vmem:[%s1498_s21 + $0x128] sm:$0xff] }
  0x5f   : > { %568 = vmatprep.subr.mxu0 %v359_v55  ;;  %772 = vmatpush1.msra.mxu1 %v364_v5  ;;  %v335_v35 = vld [vmem:[%s1498_s21 + $0x138] sm:$0xff]  ;;  %v396_v39 = vld [vmem:[%s1847_s2 + $0x20] sm:$0xff]  ;;  %v397_v41 = vld [vmem:[%s1847_s2 + $0x28] sm:$0xff] }
  0x60   : > { %569 = vmatpush2.msra.mxu0 %v358_v57  ;;  %773 = vmatprep.subr.mxu1 %v363_v7  ;;  %v235_v36 = vld [vmem:[#allocation5 + $0x58] sm:$0xff]  ;;  %v332_v40 = vld [vmem:[%s1498_s21 + $0x120] sm:$0xff]  ;;  %v238_v43 = vld [vmem:[#allocation5 + $0x70] sm:$0xff] }
  0x61   : > { %570 = vmatprep.subr.mxu0 %v357_v59  ;;  %774 = vmatpush1.msra.mxu1 %v362_v9  ;;  %v331_v42 = vld [vmem:[%s1498_s21 + $0x118] sm:$0xff]  ;;  %v330_v44 = vld [vmem:[%s1498_s21 + $0x110] sm:$0xff]  ;;  %v329_v45 = vld [vmem:[%s1498_s21 + $0x108] sm:$0xff] }
  0x62   : > { %571 = vmatpush2.msra.mxu0 %v356_v61  ;;  %775 = vmatprep.subr.mxu1 %v361_v11  ;;  %v398_v46 = vld [vmem:[%s1847_s2 + $0x30] sm:$0xff]  ;;  %v328_v47 = vld [vmem:[%s1498_s21 + $0x100] sm:$0xff]  ;;  %v399_v48 = vld [vmem:[%s1847_s2 + $0x38] sm:$0xff]  ;;  %s1130_s21 = smul.u32 6144, %s1344_s15  ;;  %s1003_s15 = scalar_lea.sflag [#allocation4], %s1494_s10 }
  0x63   : > { %572 = vmatprep.subr.mxu0 %v355_v63  ;;  %600 = vmatprep.mubr.f32.mxu0 %v225_v13  ;;  %v224_v49 = vld [vmem:[#allocation5] sm:$0xff]  ;;  %v241_v50 = vld [vmem:[#allocation5 + $0x88] sm:$0xff]  ;;  %v227_v54 = vld [vmem:[#allocation5 + $0x18] sm:$0xff] }
  0x64   : > { %573 = vmatpush2.msra.mxu0 %v354_v2  ;;  %776 = vmatpush1.msra.mxu1 %v360_v15  ;;  %v228_v51 = vld [vmem:[#allocation5 + $0x20] sm:$0xff]  ;;  %v401_v53 = vld [vmem:[%s1847_s2 + $0x48] sm:$0xff]  ;;  %v231_v56 = vld [vmem:[#allocation5 + $0x38] sm:$0xff]  ;;  %s1793_s4 = scalar_lea.hbm %s1848_s3, %s1130_s21 }
  0x65   : > { %574 = vmatprep.subr.mxu0 %v353_v4  ;;  %810 = vmatmul.mubr.f32.vlgmr.msra.gmra.mxu1 %v226_v17  ;;  %v400_v52 = vld [vmem:[%s1847_s2 + $0x40] sm:$0xff]  ;;  %v402_v57 = vld [vmem:[%s1847_s2 + $0x50] sm:$0xff]  ;;  %v403_v58 = vld [vmem:[%s1847_s2 + $0x58] sm:$0xff] }
  0x66   : > { %575 = vmatpush2.msra.mxu0 %v352_v6  ;;  %815 = vmatprep.mubr.f32.mxu1 %v1360_v0  ;;  %v244_v55 = vld [vmem:[#allocation5 + $0xa0] sm:$0xff]  ;;  %v230_v59 = vld [vmem:[#allocation5 + $0x30] sm:$0xff]  ;;  %v247_v60 = vld [vmem:[#allocation5 + $0xb8] sm:$0xff] }
  0x67   : > { %576 = vmatprep.subr.mxu0 %v351_v8  ;;  %418 = vperm.xlu0 %1212, %v392_v28   ;;  %v234_v61 = vld [vmem:[#allocation5 + $0x50] sm:$0xff]  ;;  %v404_v62 = vld [vmem:[%s1847_s2 + $0x60] sm:$0xff]  ;;  %v405_v63 = vld [vmem:[%s1847_s2 + $0x68] sm:$0xff] }
  0x68   : > { %577 = vmatpush2.msra.mxu0 %v350_v10  ;;  %428 = vperm.xlu1 %1213, %v394_v30   ;;  %v233_v1 = vld [vmem:[#allocation5 + $0x48] sm:$0xff]  ;;  %v250_v2 = vld [vmem:[#allocation5 + $0xd0] sm:$0xff]  ;;  %v407_v5 = vld [vmem:[%s1847_s2 + $0x78] sm:$0xff] }
  0x69   : > { %578 = vmatprep.subr.mxu0 %v349_v12  ;;  %816 = vmatmul.mubr.f32.gmra.mxu1 %v229_v22  ;;  %v237_v3 = vld [vmem:[#allocation5 + $0x68] sm:$0xff]  ;;  %v406_v4 = vld [vmem:[%s1847_s2 + $0x70] sm:$0xff]  ;;  %v236_v6 = vld [vmem:[#allocation5 + $0x60] sm:$0xff] }
  0x6a   : > { %579 = vmatpush2.msra.mxu0 %v348_v14  ;;  %821 = vmatprep.mubr.f32.mxu1 %v1360_v0  ;;  %v253_v7 = vld [vmem:[#allocation5 + $0xe8] sm:$0xff]  ;;  %v240_v8 = vld [vmem:[#allocation5 + $0x80] sm:$0xff]  ;;  %v239_v11 = vld [vmem:[#allocation5 + $0x78] sm:$0xff] }
  0x6b   : > { %580 = vmatprep.subr.mxu0 %v347_v16  ;;  %423 = vperm.xlu0 %1212, %v393_v32   ;;  %v408_v9 = vld [vmem:[%s1847_s2 + $0x80] sm:$0xff]  ;;  %v409_v10 = vld [vmem:[%s1847_s2 + $0x88] sm:$0xff]  ;;  %v243_v13 = vld [vmem:[#allocation5 + $0x98] sm:$0xff] }
  0x6c   : > { %581 = vmatpush2.msra.mxu0 %v346_v18  ;;  %433 = vperm.xlu1 %1213, %v395_v34   ;;  %v256_v12 = vld [vmem:[#allocation5 + $0x100] sm:$0xff]  ;;  %v410_v14 = vld [vmem:[%s1847_s2 + $0x90] sm:$0xff]  ;;  %v411_v15 = vld [vmem:[%s1847_s2 + $0x98] sm:$0xff] }
  0x6d   : > { %582 = vmatprep.subr.mxu0 %v345_v19  ;;  %822 = vmatmul.mubr.f32.gmra.mxu1 %v232_v27  ;;  %v242_v16 = vld [vmem:[#allocation5 + $0x90] sm:$0xff]  ;;  %v259_v17 = vld [vmem:[#allocation5 + $0x118] sm:$0xff]  ;;  %v412_v19 = vld [vmem:[%s1847_s2 + $0xa0] sm:$0xff] }
  0x6e   : > { %583 = vmatpush2.msra.mxu0 %v344_v20  ;;  %827 = vmatprep.mubr.f32.mxu1 %v1360_v0  ;;  %v246_v18 = vld [vmem:[#allocation5 + $0xb0] sm:$0xff]  ;;  %v413_v20 = vld [vmem:[%s1847_s2 + $0xa8] sm:$0xff]  ;;  %v252_v28 = vld [vmem:[#allocation5 + $0xe0] sm:$0xff] }
  0x6f   : > { %584 = vmatprep.subr.mxu0 %v343_v21  ;;  %438 = vperm.xlu0 %1212, %v396_v39   ;;  %v245_v21 = vld [vmem:[#allocation5 + $0xa8] sm:$0xff]  ;;  %v262_v22 = vld [vmem:[#allocation5 + $0x130] sm:$0xff]  ;;  %v268_v30 = vld [vmem:[#allocation5 + $0x160] sm:$0xff] }
  0x70   : > { %585 = vmatpush2.msra.mxu0 %v342_v23  ;;  %443 = vperm.xlu1 %1213, %v397_v41   ;;  %v249_v23 = vld [vmem:[#allocation5 + $0xc8] sm:$0xff]  ;;  %v254_v32 = vld [vmem:[#allocation5 + $0xf0] sm:$0xff]  ;;  %v263_v41 = vld [vmem:[#allocation5 + $0x138] sm:$0xff] }
  0x71   : > { %586 = vmatprep.subr.mxu0 %v341_v24  ;;  %828 = vmatmul.mubr.f32.gmra.mxu1 %v235_v36  ;;  %v414_v24 = vld [vmem:[%s1847_s2 + $0xb0] sm:$0xff]  ;;  %v265_v27 = vld [vmem:[#allocation5 + $0x148] sm:$0xff] }
  0x72   : > { %587 = vmatpush2.msra.mxu0 %v340_v25  ;;  %833 = vmatprep.mubr.f32.mxu1 %v1360_v0  ;;  %v415_v25 = vld [vmem:[%s1847_s2 + $0xb8] sm:$0xff]  ;;  %v258_v34 = vld [vmem:[#allocation5 + $0x110] sm:$0xff]  ;;  %v277_v39 = vld [vmem:[#allocation5 + $0x1a8] sm:$0xff] }
  0x73   : > { %588 = vmatprep.subr.mxu0 %v339_v26  ;;  %448 = vperm.xlu0 %1212, %v398_v46   ;;  %v248_v26 = vld [vmem:[#allocation5 + $0xc0] sm:$0xff]  ;;  %v274_v36 = vld [vmem:[#allocation5 + $0x190] sm:$0xff] }
  0x74   : > { %589 = vmatpush2.msra.mxu0 %v338_v29  ;;  %453 = vperm.xlu1 %1213, %v399_v48   ;;  %v251_v29 = vld [vmem:[#allocation5 + $0xd8] sm:$0xff]  ;;  %v270_v46 = vld [vmem:[#allocation5 + $0x170] sm:$0xff] }
  0x75   : > { %590 = vmatprep.subr.mxu0 %v337_v31  ;;  %834 = vmatmul.mubr.f32.gmra.mxu1 %v238_v43  ;;  %v255_v31 = vld [vmem:[#allocation5 + $0xf8] sm:$0xff]  ;;  %v286_v48 = vld [vmem:[#allocation5 + $0x1f0] sm:$0xff] }
  0x76   : > { %591 = vmatpush2.msra.mxu0 %v336_v33  ;;  %839 = vmatprep.mubr.f32.mxu1 %v1360_v0  ;;  %v271_v33 = vld [vmem:[#allocation5 + $0x178] sm:$0xff] }
  0x77   : > { %592 = vmatprep.subr.mxu0 %v335_v35  ;;  %458 = vperm.xlu0 %1212, %v400_v52   ;;  %v257_v35 = vld [vmem:[#allocation5 + $0x108] sm:$0xff]  ;;  %v267_v43 = vld [vmem:[#allocation5 + $0x158] sm:$0xff]  ;;  %v276_v52 = vld [vmem:[#allocation5 + $0x1a0] sm:$0xff] }
  0x78   : > { %593 = vmatpush2.msra.mxu0 %v334_v37  ;;  %463 = vperm.xlu1 %1213, %v401_v53   ;;  %v261_v37 = vld [vmem:[#allocation5 + $0x128] sm:$0xff]  ;;  %v275_v53 = vld [vmem:[#allocation5 + $0x198] sm:$0xff] }
  0x79   : > { %594 = vmatprep.subr.mxu0 %v333_v38  ;;  %840 = vmatmul.mubr.f32.gmra.mxu1 %v241_v50  ;;  %v260_v38 = vld [vmem:[#allocation5 + $0x120] sm:$0xff] }
  0x7a   : > { %595 = vmatpush2.msra.mxu0 %v332_v40  ;;  %845 = vmatprep.mubr.f32.mxu1 %v1360_v0  ;;  %v264_v40 = vld [vmem:[#allocation5 + $0x140] sm:$0xff] }
  0x7b   : > { %596 = vmatprep.subr.mxu0 %v331_v42  ;;  %468 = vperm.xlu0 %1212, %v402_v57   ;;  %v280_v42 = vld [vmem:[#allocation5 + $0x1c0] sm:$0xff]  ;;  %v295_v57 = vld [vmem:[#allocation5 + $0x238] sm:$0xff] }
  0x7c   : > { %597 = vmatpush2.msra.mxu0 %v330_v44  ;;  %473 = vperm.xlu1 %1213, %v403_v58   ;;  %v266_v44 = vld [vmem:[#allocation5 + $0x150] sm:$0xff]  ;;  %v272_v50 = vld [vmem:[#allocation5 + $0x180] sm:$0xff] }
  0x7d   : > { %598 = vmatprep.subr.mxu0 %v329_v45  ;;  %846 = vmatmul.mubr.f32.gmra.mxu1 %v244_v55  ;;  %v283_v45 = vld [vmem:[#allocation5 + $0x1d8] sm:$0xff]  ;;  %v282_v58 = vld [vmem:[#allocation5 + $0x1d0] sm:$0xff] }
  0x7e   : > { %599 = vmatpush2.msra.mxu0 %v328_v47  ;;  %851 = vmatprep.mubr.f32.mxu1 %v1360_v0  ;;  %v269_v47 = vld [vmem:[#allocation5 + $0x168] sm:$0xff]  ;;  %v279_v55 = vld [vmem:[#allocation5 + $0x1b8] sm:$0xff] }
  0x7f   : > { %601 = vmatmul.mubr.f32.vlgmr.msra.gmra.mxu0 %v224_v49  ;;  %478 = vperm.xlu0 %1212, %v404_v62   ;;  %v273_v49 = vld [vmem:[#allocation5 + $0x188] sm:$0xff]  ;;  %v288_v62 = vld [vmem:[#allocation5 + $0x200] sm:$0xff] }
  0x80   : > { %606 = vmatprep.mubr.f32.mxu0 %v228_v51  ;;  %483 = vperm.xlu1 %1213, %v405_v63   ;;  %v289_v51 = vld [vmem:[#allocation5 + $0x208] sm:$0xff]  ;;  %v287_v63 = vld [vmem:[#allocation5 + $0x1f8] sm:$0xff] }
  0x81   : > { %852 = vmatmul.mubr.f32.gmra.mxu1 %v247_v60  ;;  %v285_v60 = vld [vmem:[#allocation5 + $0x1e8] sm:$0xff] }
  0x82   : > { %857 = vmatprep.mubr.f32.mxu1 %v1360_v0 }
  0x83   : > { %607 = vmatmul.mubr.f32.gmra.mxu0 %v227_v54  ;;  %488 = vperm.xlu0 %1212, %v406_v4   ;;  %v292_v54 = vld [vmem:[#allocation5 + $0x220] sm:$0xff] }
  0x84   : > { %612 = vmatprep.mubr.f32.mxu0 %v231_v56  ;;  %493 = vperm.xlu1 %1213, %v407_v5   ;;  %v278_v56 = vld [vmem:[#allocation5 + $0x1b0] sm:$0xff] }
  0x85   : > { %858 = vmatmul.mubr.f32.gmra.mxu1 %v250_v2  ;;  %v290_v2 = vld [vmem:[#allocation5 + $0x210] sm:$0xff] }
  0x86   : > { %863 = vmatprep.mubr.f32.mxu1 %v1360_v0 }
  0x87   : > { %613 = vmatmul.mubr.f32.gmra.mxu0 %v230_v59  ;;  %498 = vperm.xlu0 %1212, %v408_v9   ;;  %v281_v59 = vld [vmem:[#allocation5 + $0x1c8] sm:$0xff] }
  0x88   : > { %618 = vmatprep.mubr.f32.mxu0 %v234_v61  ;;  %503 = vperm.xlu1 %1213, %v409_v10   ;;  %v284_v61 = vld [vmem:[#allocation5 + $0x1e0] sm:$0xff] }
  0x89   : > { %864 = vmatmul.mubr.f32.gmra.mxu1 %v253_v7 }
  0x8a   : > { %869 = vmatprep.mubr.f32.mxu1 %v1360_v0 }
  0x8b   : > { %619 = vmatmul.mubr.f32.gmra.mxu0 %v233_v1  ;;  %508 = vperm.xlu0 %1212, %v410_v14   ;;  %v291_v1 = vld [vmem:[#allocation5 + $0x218] sm:$0xff] }
  0x8c   : > { %624 = vmatprep.mubr.f32.mxu0 %v237_v3  ;;  %513 = vperm.xlu1 %1213, %v411_v15   ;;  %v293_v3 = vld [vmem:[#allocation5 + $0x228] sm:$0xff] }
  0x8d   : > { %870 = vmatmul.mubr.f32.gmra.mxu1 %v256_v12 }
  0x8e   : > { %875 = vmatprep.mubr.f32.mxu1 %v1360_v0 }
  0x8f   : > { %625 = vmatmul.mubr.f32.gmra.mxu0 %v236_v6  ;;  %518 = vperm.xlu0 %1212, %v412_v19  }
  0x90   : > { %630 = vmatprep.mubr.f32.mxu0 %v240_v8  ;;  %523 = vperm.xlu1 %1213, %v413_v20  }
  0x91   : > { %876 = vmatmul.mubr.f32.gmra.mxu1 %v259_v17 }
  0x92   : > { %881 = vmatprep.mubr.f32.mxu1 %v1360_v0 }
  0x93   : > { %631 = vmatmul.mubr.f32.gmra.mxu0 %v239_v11  ;;  %528 = vperm.xlu0 %1212, %v414_v24  }
  0x94   : > { %636 = vmatprep.mubr.f32.mxu0 %v243_v13  ;;  %533 = vperm.xlu1 %1213, %v415_v25  }
  0x95   : > { %882 = vmatmul.mubr.f32.gmra.mxu1 %v262_v22 }
  0x96   : > { %887 = vmatprep.mubr.f32.mxu1 %v1360_v0 }
  0x97   : > { %637 = vmatmul.mubr.f32.gmra.mxu0 %v242_v16 }
  0x98   : > { %642 = vmatprep.mubr.f32.mxu0 %v246_v18 }
  0x99   : > { %888 = vmatmul.mubr.f32.gmra.mxu1 %v265_v27 }
  0x9a   : > { %893 = vmatprep.mubr.f32.mxu1 %v1360_v0 }
  0x9b   : > { %643 = vmatmul.mubr.f32.gmra.mxu0 %v245_v21 }
  0x9c   : > { %648 = vmatprep.mubr.f32.mxu0 %v249_v23 }
  0x9d   : > { %894 = vmatmul.mubr.f32.gmra.mxu1 %v268_v30 }
  0x9e   : > { %899 = vmatprep.mubr.f32.mxu1 %v1360_v0 }
  0x9f   : > { %649 = vmatmul.mubr.f32.gmra.mxu0 %v248_v26 }
  0xa0   : > { %654 = vmatprep.mubr.f32.mxu0 %v252_v28 }
  0xa1   : > { %900 = vmatmul.mubr.f32.gmra.mxu1 %v271_v33 }
  0xa2   : > { %905 = vmatprep.mubr.f32.mxu1 %v1360_v0 }
  0xa3   : > { %655 = vmatmul.mubr.f32.gmra.mxu0 %v251_v29 }
  0xa4   : > { %660 = vmatprep.mubr.f32.mxu0 %v255_v31 }
  0xa5   : > { %906 = vmatmul.mubr.f32.gmra.mxu1 %v274_v36 }
  0xa6   : > { %911 = vmatprep.mubr.f32.mxu1 %v1360_v0 }
  0xa7   : > { %661 = vmatmul.mubr.f32.gmra.mxu0 %v254_v32 }
  0xa8   : > { %666 = vmatprep.mubr.f32.mxu0 %v258_v34 }
  0xa9   : > { %912 = vmatmul.mubr.f32.gmra.mxu1 %v277_v39 }
  0xaa   : > { %917 = vmatprep.mubr.f32.mxu1 %v1360_v0 }
  0xab   : > { %667 = vmatmul.mubr.f32.gmra.mxu0 %v257_v35 }
  0xac   : > { %672 = vmatprep.mubr.f32.mxu0 %v261_v37 }
  0xad   : > { %918 = vmatmul.mubr.f32.gmra.mxu1 %v280_v42 }
  0xae   : > { %923 = vmatprep.mubr.f32.mxu1 %v1360_v0 }
  0xaf   : > { %673 = vmatmul.mubr.f32.gmra.mxu0 %v260_v38 }
  0xb0   : > { %678 = vmatprep.mubr.f32.mxu0 %v264_v40 }
  0xb1   : > { %924 = vmatmul.mubr.f32.gmra.mxu1 %v283_v45 }
  0xb2   : > { %929 = vmatprep.mubr.f32.mxu1 %v1360_v0 }
  0xb3   : > { %679 = vmatmul.mubr.f32.gmra.mxu0 %v263_v41 }
  0xb4   : > { %684 = vmatprep.mubr.f32.mxu0 %v267_v43 }
  0xb5   : > { %930 = vmatmul.mubr.f32.gmra.mxu1 %v286_v48 }
  0xb6   : > { %935 = vmatprep.mubr.f32.mxu1 %v1360_v0 }
  0xb7   : > { %685 = vmatmul.mubr.f32.gmra.mxu0 %v266_v44 }
  0xb8   : > { %690 = vmatprep.mubr.f32.mxu0 %v270_v46 }
  0xb9   : > { %936 = vmatmul.mubr.f32.gmra.mxu1 %v289_v51 }
  0xba   : > { %941 = vmatprep.mubr.f32.mxu1 %v1360_v0 }
  0xbb   : > { %691 = vmatmul.mubr.f32.gmra.mxu0 %v269_v47 }
  0xbc   : > { %696 = vmatprep.mubr.f32.mxu0 %v273_v49 }
  0xbd   : > { %942 = vmatmul.mubr.f32.gmra.mxu1 %v292_v54 }
  0xbe   : > { %947 = vmatprep.mubr.f32.mxu1 %v1360_v0  ;;  %v294_v0 = vld [vmem:[#allocation5 + $0x230] sm:$0xff] }
  0xbf   : > { %697 = vmatmul.mubr.f32.gmra.mxu0 %v272_v50 }
  0xc0   : > { %702 = vmatprep.mubr.f32.mxu0 %v276_v52 }
  0xc1   : > { %948 = vmatmul.mubr.f32.gmra.mxu1 %v295_v57 }
  0xc3   : > { %703 = vmatmul.mubr.f32.gmra.mxu0 %v275_v53 }
  0xc4   : > { %708 = vmatprep.mubr.f32.mxu0 %v279_v55 }
  0xc7   : > { %709 = vmatmul.mubr.f32.gmra.mxu0 %v278_v56 }
  0xc8   : > { %714 = vmatprep.mubr.f32.mxu0 %v282_v58 }
  0xcb   : > { %715 = vmatmul.mubr.f32.gmra.mxu0 %v281_v59 }
  0xcc   : > { %720 = vmatprep.mubr.f32.mxu0 %v285_v60 }
  0xcf   : > { %721 = vmatmul.mubr.f32.gmra.mxu0 %v284_v61 }
  0xd0   : > { %726 = vmatprep.mubr.f32.mxu0 %v288_v62 }
  0xd3   : > { %727 = vmatmul.mubr.f32.gmra.mxu0 %v287_v63 }
  0xd4   : > { %732 = vmatprep.mubr.f32.mxu0 %v291_v1 }
  0xd7   : > { %733 = vmatmul.mubr.f32.gmra.mxu0 %v290_v2 }
  0xd8   : > { %738 = vmatprep.mubr.f32.mxu0 %v294_v0 }
  0xdb   : > { %739 = vmatmul.mubr.f32.gmra.mxu0 %v293_v3 }
  0xe2   : > { %v419_v12 = vpop.permute.xlu0 %418 }
  0xe3   : > { %v429_v27 = vpop.permute.xlu1 %428 }
  0xe6   : > { %v424_v18 = vpop.permute.xlu0 %423 }
  0xe7   : > { %v434_v39 = vpop.permute.xlu1 %433 }
  0xea   : > { %v439_v48 = vpop.permute.xlu0 %438 }
  0xeb   : > { %v444_v56 = vpop.permute.xlu1 %443 }
  0xee   : > { %v449_v2 = vpop.permute.xlu0 %448 }
 0x125   : > { %v811_v4 = vpop.f32.mrf.mxu1 }
 0x127   : > { %v813_v5 = vpop.f32.mrf.mxu1 }
 0x129   : > { %v817_v6 = vpop.f32.mrf.mxu1 }
 0x12b   : > { %v819_v7 = vpop.f32.mrf.mxu1 }
 0x12d   : > { %v823_v8 = vpop.f32.mrf.mxu1 }
 0x12f   : > { %v825_v9 = vpop.f32.mrf.mxu1 }
 0x131   : > { %v829_v10 = vpop.f32.mrf.mxu1 }
 0x133   : > { %v831_v11 = vpop.f32.mrf.mxu1 }
 0x135   : > { %v835_v13 = vpop.f32.mrf.mxu1 }
 0x137   : > { %v837_v14 = vpop.f32.mrf.mxu1 }
 0x139   : > { %v841_v16 = vpop.f32.mrf.mxu1 }
 0x13b   : > { %v843_v20 = vpop.f32.mrf.mxu1 }
 0x13d   : > { %v1701_v24 = vpop.f32.mrf.mxu1 }
 0x13f   : > { %v602_v15 = vpop.f32.mrf.mxu0  ;;  %v849_v29 = vpop.f32.mrf.mxu1 }
 0x140   : > { %v603_v17 = vadd.f32 %v602_v15, %v419_v12 }
 0x141   : > { %v604_v19 = vpop.f32.mrf.mxu0  ;;  %v1707_v33 = vpop.f32.mrf.mxu1 }
 0x142   : > { %v812_v21 = vadd.f32 %v811_v4, %v603_v17  ;;  %v605_v22 = vadd.f32 %v604_v19, %v419_v12  ;;  %v459_v19 = vpop.permute.xlu0 %458 }
 0x143   : > { %v608_v23 = vpop.f32.mrf.mxu0  ;;  %v1710_v37 = vpop.f32.mrf.mxu1 }
 0x144   : > { %954 = vst [vmem:[%s1703_s24] sm:$0xff] %v812_v21  ;;  %v814_v25 = vadd.f32 %v813_v5, %v605_v22  ;;  %v609_v26 = vadd.f32 %v608_v23, %v424_v18 }
 0x145   : > { %v610_v28 = vpop.f32.mrf.mxu0  ;;  %v1713_v42 = vpop.f32.mrf.mxu1 }
 0x146   : > { %955 = vst [vmem:[%s1703_s24 + $0x8] sm:$0xff] %v814_v25  ;;  %v818_v30 = vadd.f32 %v817_v6, %v609_v26  ;;  %v611_v31 = vadd.f32 %v610_v28, %v424_v18 }
 0x147   : > { %v614_v32 = vpop.f32.mrf.mxu0  ;;  %v1716_v46 = vpop.f32.mrf.mxu1 }
 0x148   : > { %956 = vst [vmem:[%s1703_s24 + $0x10] sm:$0xff] %v818_v30  ;;  %v820_v34 = vadd.f32 %v819_v7, %v611_v31  ;;  %v615_v35 = vadd.f32 %v614_v32, %v429_v27 }
 0x149   : > { %v616_v36 = vpop.f32.mrf.mxu0  ;;  %v1719_v51 = vpop.f32.mrf.mxu1 }
 0x14a   : > { %957 = vst [vmem:[%s1703_s24 + $0x18] sm:$0xff] %v820_v34  ;;  %v824_v38 = vadd.f32 %v823_v8, %v615_v35  ;;  %v617_v40 = vadd.f32 %v616_v36, %v429_v27 }
 0x14b   : > { %v620_v41 = vpop.f32.mrf.mxu0  ;;  %v1722_v55 = vpop.f32.mrf.mxu1 }
 0x14c   : > { %958 = vst [vmem:[%s1703_s24 + $0x20] sm:$0xff] %v824_v38  ;;  %v826_v43 = vadd.f32 %v825_v9, %v617_v40  ;;  %v621_v44 = vadd.f32 %v620_v41, %v434_v39 }
 0x14d   : > { %v622_v45 = vpop.f32.mrf.mxu0  ;;  %v1725_v60 = vpop.f32.mrf.mxu1 }
 0x14e   : > { %959 = vst [vmem:[%s1703_s24 + $0x28] sm:$0xff] %v826_v43  ;;  %v830_v47 = vadd.f32 %v829_v10, %v621_v44  ;;  %v623_v49 = vadd.f32 %v622_v45, %v434_v39  ;;  %v454_v10 = vpop.permute.xlu1 %453 }
 0x14f   : > { %v626_v50 = vpop.f32.mrf.mxu0  ;;  %v1728_v1 = vpop.f32.mrf.mxu1 }
 0x150   : > { %960 = vst [vmem:[%s1703_s24 + $0x30] sm:$0xff] %v830_v47  ;;  %v832_v52 = vadd.f32 %v831_v11, %v623_v49  ;;  %v627_v53 = vadd.f32 %v626_v50, %v439_v48 }
 0x151   : > { %v628_v54 = vpop.f32.mrf.mxu0  ;;  %v1731_v5 = vpop.f32.mrf.mxu1 }
 0x152   : > { %961 = vst [vmem:[%s1703_s24 + $0x38] sm:$0xff] %v832_v52  ;;  %v836_v57 = vadd.f32 %v835_v13, %v627_v53  ;;  %v629_v58 = vadd.f32 %v628_v54, %v439_v48  ;;  %v464_v28 = vpop.permute.xlu1 %463 }
 0x153   : > { %v632_v59 = vpop.f32.mrf.mxu0  ;;  %v1734_v9 = vpop.f32.mrf.mxu1 }
 0x154   : > { %962 = vst [vmem:[%s1703_s24 + $0x40] sm:$0xff] %v836_v57  ;;  %v838_v61 = vadd.f32 %v837_v14, %v629_v58  ;;  %v633_v62 = vadd.f32 %v632_v59, %v444_v56 }
 0x155   : > { %v634_v63 = vpop.f32.mrf.mxu0  ;;  %v1738_v14 = vpop.f32.mrf.mxu1 }
 0x156   : > { %963 = vst [vmem:[%s1703_s24 + $0x48] sm:$0xff] %v838_v61  ;;  %v842_v0 = vadd.f32 %v841_v16, %v633_v62  ;;  %v635_v3 = vadd.f32 %v634_v63, %v444_v56 }
 0x157   : > { %v638_v4 = vpop.f32.mrf.mxu0  ;;  %v1741_v18 = vpop.f32.mrf.mxu1 }
 0x158   : > { %964 = vst [vmem:[%s1703_s24 + $0x50] sm:$0xff] %v842_v0  ;;  %v844_v6 = vadd.f32 %v843_v20, %v635_v3  ;;  %v639_v7 = vadd.f32 %v638_v4, %v449_v2 }
 0x159   : > { %v640_v8 = vpop.f32.mrf.mxu0  ;;  %v889_v23 = vpop.f32.mrf.mxu1 }
 0x15a   : > { %965 = vst [vmem:[%s1703_s24 + $0x58] sm:$0xff] %v844_v6  ;;  %v848_v11 = vadd.f32 %v1701_v24, %v639_v7  ;;  %v641_v12 = vadd.f32 %v640_v8, %v449_v2 }
 0x15b   : > { %v644_v13 = vpop.f32.mrf.mxu0  ;;  %v891_v27 = vpop.f32.mrf.mxu1 }
 0x15c   : > { %966 = vst [vmem:[%s1703_s24 + $0x60] sm:$0xff] %v848_v11  ;;  %v850_v15 = vadd.f32 %v849_v29, %v641_v12  ;;  %v645_v16 = vadd.f32 %v644_v13, %v454_v10 }
 0x15d   : > { %v646_v17 = vpop.f32.mrf.mxu0  ;;  %v895_v32 = vpop.f32.mrf.mxu1 }
 0x15e   : > { %967 = vst [vmem:[%s1703_s24 + $0x68] sm:$0xff] %v850_v15  ;;  %v854_v20 = vadd.f32 %v1707_v33, %v645_v16  ;;  %v647_v21 = vadd.f32 %v646_v17, %v454_v10 }
 0x15f   : > { %v650_v22 = vpop.f32.mrf.mxu0  ;;  %v897_v36 = vpop.f32.mrf.mxu1 }
 0x160   : > { %968 = vst [vmem:[%s1703_s24 + $0x70] sm:$0xff] %v854_v20  ;;  %v856_v24 = vadd.f32 %v1710_v37, %v647_v21  ;;  %v651_v25 = vadd.f32 %v650_v22, %v459_v19  ;;  %v469_v37 = vpop.permute.xlu0 %468 }
 0x161   : > { %v652_v26 = vpop.f32.mrf.mxu0  ;;  %v901_v41 = vpop.f32.mrf.mxu1 }
 0x162   : > { %969 = vst [vmem:[%s1703_s24 + $0x78] sm:$0xff] %v856_v24  ;;  %v860_v29 = vadd.f32 %v1713_v42, %v651_v25  ;;  %v653_v30 = vadd.f32 %v652_v26, %v459_v19 }
 0x163   : > { %v656_v31 = vpop.f32.mrf.mxu0  ;;  %v903_v45 = vpop.f32.mrf.mxu1 }
 0x164   : > { %970 = vst [vmem:[%s1703_s24 + $0x80] sm:$0xff] %v860_v29  ;;  %v862_v33 = vadd.f32 %v1716_v46, %v653_v30  ;;  %v657_v34 = vadd.f32 %v656_v31, %v464_v28  ;;  %v474_v46 = vpop.permute.xlu1 %473 }
 0x165   : > { %v658_v35 = vpop.f32.mrf.mxu0  ;;  %v907_v50 = vpop.f32.mrf.mxu1 }
 0x166   : > { %971 = vst [vmem:[%s1703_s24 + $0x88] sm:$0xff] %v862_v33  ;;  %v866_v38 = vadd.f32 %v1719_v51, %v657_v34  ;;  %v659_v39 = vadd.f32 %v658_v35, %v464_v28 }
 0x167   : > { %v662_v40 = vpop.f32.mrf.mxu0  ;;  %v909_v54 = vpop.f32.mrf.mxu1 }
 0x168   : > { %972 = vst [vmem:[%s1703_s24 + $0x90] sm:$0xff] %v866_v38  ;;  %v868_v42 = vadd.f32 %v1722_v55, %v659_v39  ;;  %v663_v43 = vadd.f32 %v662_v40, %v469_v37  ;;  %v479_v55 = vpop.permute.xlu0 %478 }
 0x169   : > { %v664_v44 = vpop.f32.mrf.mxu0  ;;  %v913_v59 = vpop.f32.mrf.mxu1 }
 0x16a   : > { %973 = vst [vmem:[%s1703_s24 + $0x98] sm:$0xff] %v868_v42  ;;  %v872_v47 = vadd.f32 %v1725_v60, %v663_v43  ;;  %v665_v48 = vadd.f32 %v664_v44, %v469_v37 }
 0x16b   : > { %v668_v49 = vpop.f32.mrf.mxu0  ;;  %v915_v63 = vpop.f32.mrf.mxu1 }
 0x16c   : > { %974 = vst [vmem:[%s1703_s24 + $0xa0] sm:$0xff] %v872_v47  ;;  %v874_v51 = vadd.f32 %v1728_v1, %v665_v48  ;;  %v669_v52 = vadd.f32 %v668_v49, %v474_v46  ;;  %v484_v1 = vpop.permute.xlu1 %483  ;;  %v489_v8 = vpop.permute.xlu0 %488 }
 0x16d   : > { %v670_v53 = vpop.f32.mrf.mxu0  ;;  %v919_v4 = vpop.f32.mrf.mxu1 }
 0x16e   : > { %975 = vst [vmem:[%s1703_s24 + $0xa8] sm:$0xff] %v874_v51  ;;  %v878_v56 = vadd.f32 %v1731_v5, %v669_v52  ;;  %v671_v57 = vadd.f32 %v670_v53, %v474_v46 }
 0x16f   : > { %v674_v58 = vpop.f32.mrf.mxu0  ;;  %v921_v12 = vpop.f32.mrf.mxu1 }
 0x170   : > { %976 = vst [vmem:[%s1703_s24 + $0xb0] sm:$0xff] %v878_v56  ;;  %v880_v60 = vadd.f32 %v1734_v9, %v671_v57  ;;  %v675_v61 = vadd.f32 %v674_v58, %v479_v55  ;;  %v494_v16 = vpop.permute.xlu1 %493  ;;  %v499_v24 = vpop.permute.xlu0 %498 }
 0x171   : > { %v676_v62 = vpop.f32.mrf.mxu0  ;;  %v925_v20 = vpop.f32.mrf.mxu1 }
 0x172   : > { %977 = vst [vmem:[%s1703_s24 + $0xb8] sm:$0xff] %v880_v60  ;;  %v884_v2 = vadd.f32 %v1738_v14, %v675_v61  ;;  %v677_v0 = vadd.f32 %v676_v62, %v479_v55 }
 0x173   : > { %v680_v3 = vpop.f32.mrf.mxu0  ;;  %v927_v28 = vpop.f32.mrf.mxu1 }
 0x174   : > { %978 = vst [vmem:[%s1703_s24 + $0xc0] sm:$0xff] %v884_v2  ;;  %v886_v5 = vadd.f32 %v1741_v18, %v677_v0  ;;  %v681_v6 = vadd.f32 %v680_v3, %v484_v1  ;;  %v509_v40 = vpop.permute.xlu0 %508 }
 0x175   : > { %v682_v7 = vpop.f32.mrf.mxu0 }
 0x176   : > { %979 = vst [vmem:[%s1703_s24 + $0xc8] sm:$0xff] %v886_v5  ;;  %v890_v9 = vadd.f32 %v889_v23, %v681_v6  ;;  %v683_v10 = vadd.f32 %v682_v7, %v484_v1 }
 0x177   : > { %v686_v11 = vpop.f32.mrf.mxu0 }
 0x178   : > { %980 = vst [vmem:[%s1703_s24 + $0xd0] sm:$0xff] %v890_v9  ;;  %v892_v13 = vadd.f32 %v891_v27, %v683_v10  ;;  %v687_v14 = vadd.f32 %v686_v11, %v489_v8  ;;  %v519_v56 = vpop.permute.xlu0 %518 }
 0x179   : > { %v688_v15 = vpop.f32.mrf.mxu0 }
 0x17a   : > { %981 = vst [vmem:[%s1703_s24 + $0xd8] sm:$0xff] %v892_v13  ;;  %v896_v17 = vadd.f32 %v895_v32, %v687_v14  ;;  %v689_v19 = vadd.f32 %v688_v15, %v489_v8  ;;  %v504_v32 = vpop.permute.xlu1 %503 }
 0x17b   : > { %v692_v18 = vpop.f32.mrf.mxu0 }
 0x17c   : > { %982 = vst [vmem:[%s1703_s24 + $0xe0] sm:$0xff] %v896_v17  ;;  %v898_v21 = vadd.f32 %v897_v36, %v689_v19  ;;  %v693_v22 = vadd.f32 %v692_v18, %v494_v16  ;;  %v931_v36 = vpop.f32.mrf.mxu1  ;;  %v529_v8 = vpop.permute.xlu0 %528 }
 0x17d   : > { %v694_v23 = vpop.f32.mrf.mxu0 }
 0x17e   : > { %983 = vst [vmem:[%s1703_s24 + $0xe8] sm:$0xff] %v898_v21  ;;  %v902_v25 = vadd.f32 %v901_v41, %v693_v22  ;;  %v695_v26 = vadd.f32 %v694_v23, %v494_v16  ;;  %v933_v44 = vpop.f32.mrf.mxu1  ;;  %v514_v48 = vpop.permute.xlu1 %513 }
 0x17f   : > { %v698_v27 = vpop.f32.mrf.mxu0 }
 0x180   : > { %984 = vst [vmem:[%s1703_s24 + $0xf0] sm:$0xff] %v902_v25  ;;  %v904_v29 = vadd.f32 %v903_v45, %v695_v26  ;;  %v699_v30 = vadd.f32 %v698_v27, %v499_v24  ;;  %v937_v52 = vpop.f32.mrf.mxu1 }
 0x181   : > { %v700_v31 = vpop.f32.mrf.mxu0 }
 0x182   : > { %985 = vst [vmem:[%s1703_s24 + $0xf8] sm:$0xff] %v904_v29  ;;  %v908_v33 = vadd.f32 %v907_v50, %v699_v30  ;;  %v701_v34 = vadd.f32 %v700_v31, %v499_v24  ;;  %v939_v60 = vpop.f32.mrf.mxu1  ;;  %v524_v1 = vpop.permute.xlu1 %523 }
 0x183   : > { %v704_v35 = vpop.f32.mrf.mxu0 }
 0x184   : > { %986 = vst [vmem:[%s1703_s24 + $0x100] sm:$0xff] %v908_v33  ;;  %v910_v37 = vadd.f32 %v909_v54, %v701_v34  ;;  %v705_v38 = vadd.f32 %v704_v35, %v504_v32 }
 0x185   : > { %v706_v39 = vpop.f32.mrf.mxu0 }
 0x186   : > { %987 = vst [vmem:[%s1703_s24 + $0x108] sm:$0xff] %v910_v37  ;;  %v914_v41 = vadd.f32 %v913_v59, %v705_v38  ;;  %v707_v42 = vadd.f32 %v706_v39, %v504_v32  ;;  %v534_v16 = vpop.permute.xlu1 %533 }
 0x187   : > { %v710_v43 = vpop.f32.mrf.mxu0 }
 0x188   : > { %988 = vst [vmem:[%s1703_s24 + $0x110] sm:$0xff] %v914_v41  ;;  %v916_v45 = vadd.f32 %v915_v63, %v707_v42  ;;  %v711_v46 = vadd.f32 %v710_v43, %v509_v40 }
 0x189   : > { %v712_v47 = vpop.f32.mrf.mxu0 }
 0x18a   : > { %989 = vst [vmem:[%s1703_s24 + $0x118] sm:$0xff] %v916_v45  ;;  %v920_v49 = vadd.f32 %v919_v4, %v711_v46  ;;  %v713_v50 = vadd.f32 %v712_v47, %v509_v40  ;;  %v943_v4 = vpop.f32.mrf.mxu1 }
 0x18b   : > { %v716_v51 = vpop.f32.mrf.mxu0 }
 0x18c   : > { %990 = vst [vmem:[%s1703_s24 + $0x120] sm:$0xff] %v920_v49  ;;  %v922_v53 = vadd.f32 %v921_v12, %v713_v50  ;;  %v717_v54 = vadd.f32 %v716_v51, %v514_v48  ;;  %v945_v12 = vpop.f32.mrf.mxu1 }
 0x18d   : > { %v718_v55 = vpop.f32.mrf.mxu0 }
 0x18e   : > { %991 = vst [vmem:[%s1703_s24 + $0x128] sm:$0xff] %v922_v53  ;;  %v926_v57 = vadd.f32 %v925_v20, %v717_v54  ;;  %v719_v58 = vadd.f32 %v718_v55, %v514_v48  ;;  %v949_v20 = vpop.f32.mrf.mxu1 }
 0x18f   : > { %v722_v59 = vpop.f32.mrf.mxu0 }
 0x190   : > { %992 = vst [vmem:[%s1703_s24 + $0x130] sm:$0xff] %v926_v57  ;;  %v928_v61 = vadd.f32 %v927_v28, %v719_v58  ;;  %v723_v62 = vadd.f32 %v722_v59, %v519_v56  ;;  %v951_v26 = vpop.f32.mrf.mxu1 }
 0x191   : > { %v724_v63 = vpop.f32.mrf.mxu0 }
 0x192   : > { %993 = vst [vmem:[%s1703_s24 + $0x138] sm:$0xff] %v928_v61  ;;  %v932_v2 = vadd.f32 %v931_v36, %v723_v62  ;;  %v725_v0 = vadd.f32 %v724_v63, %v519_v56 }
 0x193   : > { %v728_v3 = vpop.f32.mrf.mxu0 }
 0x194   : > { %994 = vst [vmem:[%s1703_s24 + $0x140] sm:$0xff] %v932_v2  ;;  %v934_v5 = vadd.f32 %v933_v44, %v725_v0  ;;  %v729_v6 = vadd.f32 %v728_v3, %v524_v1 }
 0x195   : > { %v730_v7 = vpop.f32.mrf.mxu0 }
 0x196   : > { %995 = vst [vmem:[%s1703_s24 + $0x148] sm:$0xff] %v934_v5  ;;  %v938_v9 = vadd.f32 %v937_v52, %v729_v6  ;;  %v731_v10 = vadd.f32 %v730_v7, %v524_v1 }
 0x197   : > { %v734_v11 = vpop.f32.mrf.mxu0 }
 0x198   : > { %996 = vst [vmem:[%s1703_s24 + $0x150] sm:$0xff] %v938_v9  ;;  %v940_v13 = vadd.f32 %v939_v60, %v731_v10  ;;  %v735_v14 = vadd.f32 %v734_v11, %v529_v8 }
 0x199   : > { %v736_v15 = vpop.f32.mrf.mxu0 }
 0x19a   : > { %997 = vst [vmem:[%s1703_s24 + $0x158] sm:$0xff] %v940_v13  ;;  %v944_v17 = vadd.f32 %v943_v4, %v735_v14  ;;  %v737_v19 = vadd.f32 %v736_v15, %v529_v8 }
 0x19b   : > { %v740_v18 = vpop.f32.mrf.mxu0 }
 0x19c   : > { %998 = vst [vmem:[%s1703_s24 + $0x160] sm:$0xff] %v944_v17  ;;  %v946_v21 = vadd.f32 %v945_v12, %v737_v19  ;;  %v741_v22 = vadd.f32 %v740_v18, %v534_v16 }
 0x19d   : > { %v742_v23 = vpop.f32.mrf.mxu0 }
 0x19e   : > { %999 = vst [vmem:[%s1703_s24 + $0x168] sm:$0xff] %v946_v21  ;;  %v950_v24 = vadd.f32 %v949_v20, %v741_v22  ;;  %v743_v25 = vadd.f32 %v742_v23, %v534_v16 }
 0x1a0   : > { %1000 = vst [vmem:[%s1703_s24 + $0x170] sm:$0xff] %v950_v24  ;;  %v952_v27 = vadd.f32 %v951_v26, %v743_v25 }
 0x1a2   : > { %1001 = vst [vmem:[%s1703_s24 + $0x178] sm:$0xff] %v952_v27 }
 0x1a3   : > { %1281 = shalt.err (!%p1278_p6)
}
 0x1a4   : > { %s1282_s11 = scalar_lea.hbm %s1793_s4, 6144  ;;  %s1286_s29 = scalar_lea.hbm %s1848_s3, 12288 }
 0x1a5   : > { %p1283_p4 = scmp.ne.s32.totalorder %s1793_s4, %s1282_s11  ;;  %p1287_p0 = scmp.lt.s32.totalorder %s1793_s4, %s1848_s3 }
 0x1a6   : > { %p1288_p3 = scmp.lt.s32.totalorder %s1286_s29, %s1282_s11 }
 0x1a7   : > { %p1284_p9 = pnand %p1283_p4, %p1468_p13 }
 0x1a8   : > { %p1289_p1 = por %p1288_p3, %p1287_p0 }
 0x1a9   : > { %p1285_p12 = pneg %p1284_p9 }
 0x1ab   : > { %p1290_p8 = pnand %p1289_p1, %p1285_p12 }
 0x1ad   : > { %1293 = shalt.err (!%p1290_p8)
}
 0x1ae   : > { %s1363_s24 = smov 256   ;;  %s1364_s21 = smov 16  }
 0x1af   : > { %1137 = dma.vmem_to_hbm [thread:$0]  (%p1468_p13), %s1795_s26, 6144, %s1793_s4, %s1003_s15, %s1363_s24, %s1363_s24, %s1364_s21  }
 0x1b0 PF: > { %s1033_s27 = sand.u32 1, %s1332_s12   ;;  %p1859_p11 = scmp.ne.s32.totalorder %s1853_s23, 0 }
 0x1b1   : > { %s1034_s30 = scalar_lea.sflag [#allocation4], %s1033_s27 }
 0x1b2   : > { %p1148_p2 = pnand %p1119_p10, %p1859_p11 }
 0x1b4   : > { %p1149_p5 = pneg %p1148_p2 }
 0x1b6   : > { %1327 = dma.done.wait (%p1149_p5), %s1034_s30, 6144  }
 0x1b7   : > { %1329 = vsyncadd (%p1149_p5), %s1034_s30, 4294961152  ;;  %s20_s17 = sadd.s32 1, %s1352_s17   ;;  %s1860_s12 = smov %s1336_s13 }
 0x1b8   : > { %p17_p7 = scmp.ge.s32.totalorder %s20_s17, 4   ;;  %s1861_s13 = smov %s1340_s14 }
 0x1b9   : > { %s1862_s14 = smov %s1477_s18  ;;  %s1863_s15 = smov %s1348_s16 }
 0x1ba   : > { %s1864_s16 = smov %s1866_s28  ;;  %19 = sbr.rel (!%p17_p7) target bundleno = 7 (0x7), region = 81 }
 0x1bf   :  { %1039 = vsyncpa [#allocation3], 1 }
 0x1c0   :  { %1041 = vsyncpa [#allocation3 + $0x1], 1 }
 0x1c1   :  { %1042 = vsyncpa [#allocation6], 1 }
 0x1c2   :  { %1043 = vsyncpa [#allocation4], 1 }
 0x1c3   :  { %1045 = vsyncpa [#allocation4 + $0x1], 1 }

</bundles_post_ra>
